<compile_context>
chip_gen: v5e
topology: v5e:2x2
jax: 0.10.0
libtpu: 0.0.40
codegen_flags: <defaults>
</compile_context>

<pallas_src>
import jax
import jax.numpy as jnp
from jax.experimental import pallas as pl
from jax.experimental.pallas import tpu as pltpu

_LANES = 128
# Rows per block for the tiled (large-input) path: 1024 x 128 f32 = 512 KiB per
# block; with input+output double-buffered that's ~2 MiB of VMEM -> safe on
# v5e/v6e/v7x and large enough to reach ~85%+ of HBM bandwidth.
_BLOCK_ROWS = 1024
# Below this many rows the whole slab (<= 1 MiB f32) goes in one VMEM block.
_SINGLE_BLOCK_ROWS = 2048


def _relu_kernel(x_ref, o_ref):
    # Pure VPU elementwise: max(x, 0). Scalar constant -> no broadcast vreg fill.
    o_ref[...] = jnp.maximum(x_ref[...], 0.0)


def pallas_relu(x: jax.Array) -> jax.Array:
    """y = max(x, 0), computed in a Pallas TPU kernel."""
    orig_shape = x.shape
    orig_dtype = x.dtype

    flat = x.reshape(-1)
    n = flat.shape[0]

    # Lane-dense 2-D slab. The example shape (2, 4, 16, 16) = 2048 elements
    # divides 128 exactly, so this pad never fires on the hot path.
    rem = n % _LANES
    if rem != 0:
        # TODO(synk): ragged tails could use a masked store instead of a padded
        # copy; not triggered by the shapes this module is used with.
        flat = jnp.pad(flat, (0, _LANES - rem))
    x2d = flat.reshape(-1, _LANES)
    rows = x2d.shape[0]

    if rows <= _SINGLE_BLOCK_ROWS:
        # Single whole-array VMEM block, no grid -> no per-step overhead.
        out2d = pl.pallas_call(
            _relu_kernel,
            out_shape=jax.ShapeDtypeStruct((rows, _LANES), orig_dtype),
            in_specs=[pl.BlockSpec(memory_space=pltpu.MemorySpace.VMEM)],
            out_specs=pl.BlockSpec(memory_space=pltpu.MemorySpace.VMEM),
        )(x2d)
    else:
        # Large-input path: big lane-dense blocks, parallel 1-D grid so both
        # v7x TensorCores get work (no-op on v5e/v6e).
        pad_rows = (-rows) % _BLOCK_ROWS
        if pad_rows:
            x2d = jnp.pad(x2d, ((0, pad_rows), (0, 0)))
        padded_rows = rows + pad_rows
        out2d = pl.pallas_call(
            _relu_kernel,
            out_shape=jax.ShapeDtypeStruct((padded_rows, _LANES), orig_dtype),
            grid=(padded_rows // _BLOCK_ROWS,),
            in_specs=[pl.BlockSpec((_BLOCK_ROWS, _LANES), lambda i: (i, 0))],
            out_specs=pl.BlockSpec((_BLOCK_ROWS, _LANES), lambda i: (i, 0)),
            compiler_params=pltpu.CompilerParams(
                dimension_semantics=("parallel",),
                vmem_limit_bytes=32 * 1024 * 1024,
            ),
        )(x2d)
        out2d = out2d[:rows]

    return out2d.reshape(-1)[:n].reshape(orig_shape)


if __name__ == "__main__":
    key = jax.random.PRNGKey(0)
    # NCHW input consistent with a conv-style activation: batch=2, channels=4, 16x16.
    x = jax.random.normal(key, (2, 4, 16, 16), dtype=jnp.float32)

    y = pallas_relu(x)
    y = jax.block_until_ready(y)

    # Reference check in plain JAX: clamp_min(0.0) == max(x, 0).
    y_ref = jnp.maximum(x, 0.0)
    assert y.shape == x.shape and y.dtype == x.dtype
    assert jnp.max(jnp.abs(y - y_ref)) < 1e-6

    print("KERNEL_OK")
</pallas_src>

<mosaic_0001>
module attributes {stable_mosaic.version = 11 : i64} {
  func.func @_relu_kernel(%arg0: memref<16x128xf32, #tpu.memory_space<vmem>>, %arg1: memref<16x128xf32, #tpu.memory_space<vmem>>) attributes {dimension_semantics = [], scalar_prefetch = 0 : i64, scratch_operands = 0 : i64, tpu.core_type = #tpu.core_type<tc>} {
    %c0 = arith.constant 0 : index
    %c0_0 = arith.constant 0 : index
    %0 = vector.load %arg0[%c0, %c0_0] : memref<16x128xf32, #tpu.memory_space<vmem>>, vector<16x128xf32>
    %cst = arith.constant 0.000000e+00 : f32
    %1 = vector.broadcast %cst : f32 to vector<16x128xf32>
    %2 = arith.maximumf %0, %1 : vector<16x128xf32>
    %c0_1 = arith.constant 0 : index
    %c0_2 = arith.constant 0 : index
    %3 = vector.load %arg1[%c0_1, %c0_2] : memref<16x128xf32, #tpu.memory_space<vmem>>, vector<16x128xf32>
    tpu.vector_store %arg1[%c0_1, %c0_2], %2 {strides = array<i32>} : memref<16x128xf32, #tpu.memory_space<vmem>>, vector<16x128xf32>,
    return
  }
}

</mosaic_0001>

<bundles_post_ra>
// kernel: tpu_custom_call.1
= control target key start
LH: loop header
LB: loop body
LE: loop exit
PB: predicated region body
PF: predicated region fallthrough
CT: control target
= control target key end

     0   :  { %6 = vsyncpa [#allocation3], 0  ;;  %s126_s0 = inlined_call_operand.hbm [shape: f32[16,128], index: 0, kind: input, shape index: {}]   ;;  %s127_s1 = inlined_call_operand.hbm [shape: f32[16,128], index: 1, kind: output, shape index: {}]  }
   0x1   :  { %7 = vsyncpa [#allocation4], 0  ;;  %s12_s8 = sshll.u32 %s126_s0, 4  ;;  %s106_s9 = smov [#allocation2]   ;;  %s13_s8 = int_to_ptr.hbm [resolvable:$true] %s12_s8 }
   0x2   :  { %s14_s10 = sshll.u32 %s106_s9, 4  ;;  %s107_s11 = smov 128   ;;  %s15_s10 = int_to_ptr.vmem [resolvable:$true] %s14_s10 }
   0x3   :  { %s108_s12 = smov 8  }
   0x4   :  { %20 = dma.hbm_to_vmem [thread:$0]  %s13_s8, 256, %s15_s10, [#allocation3], %s107_s11, %s107_s11, %s108_s12  }
   0x5   :  { %102 = dma.done.wait [#allocation3], 256  }
   0x6   :  { %103 = vsyncadd [#allocation3], 4294967040  ;;  %s109_s13 = smov [#allocation5]   ;;  %s37_s17 = sshll.u32 %s127_s1, 4  ;;  %v25_v0 = vld [vmem:[#allocation2] sm:$0xff]  ;;  %v26_v1 = vld [vmem:[#allocation2 + $0x8] sm:$0xff]  ;;  %s38_s17 = int_to_ptr.hbm [resolvable:$true] %s37_s17 }
   0x7   :  { %s35_s14 = sshll.u32 %s109_s13, 4  ;;  %v27_v2 = vmax.f32 %v25_v0, 0.0  ;;  %v28_v3 = vmax.f32 %v26_v1, 0.0  ;;  %s36_s14 = int_to_ptr.vmem [resolvable:$true] %s35_s14 }
   0x9   :  { %29 = vst [vmem:[#allocation5] sm:$0xff] %v27_v2 }
   0xa   :  { %30 = vst [vmem:[#allocation5 + $0x8] sm:$0xff] %v28_v3 }
   0xb   :  { %43 = dma.vmem_to_hbm [thread:$0]  %s36_s14, 256, %s38_s17, [#allocation4], %s107_s11, %s107_s11, %s108_s12  }
   0xc   :  { %104 = dma.done.wait [#allocation4], 256  }
   0xd   :  { %105 = vsyncadd [#allocation4], 4294967040 }
   0xe   :  { %48 = vsyncpa [#allocation3], 1 }
   0xf   :  { %49 = vsyncpa [#allocation4], 1 }

</bundles_post_ra>
